<compile_context>
chip_gen: v6e
topology: v6e:2x2x1
jax: 0.10.0
libtpu: 0.0.40
codegen_flags: <defaults>
</compile_context>

<pallas_src>
import jax
import jax.numpy as jnp
from jax.experimental import pallas as pl
from jax.experimental.pallas import tpu as pltpu


def _round_up(n, m):
    return ((n + m - 1) // m) * m


def house_price_kernel(xt_ref, wt_ref, b_ref, o_ref):
    # xt_ref: [F, tile_n]  (batch on lanes)
    # wt_ref: [1, F]       (folded weight, transposed)
    # b_ref : [1, 1]       (folded bias)
    # o_ref : [1, tile_n]  (lane-dense output)
    y = jnp.dot(wt_ref[...], xt_ref[...], preferred_element_type=jnp.float32)
    o_ref[...] = (y + b_ref[...]).astype(o_ref.dtype)


def fold_affine_params(params):
    """Fold the 4 Linear layers into one affine map (exact: no nonlinearities)."""
    w1, b1 = params["w1"], params["b1"]
    w2, b2 = params["w2"], params["b2"]
    w3, b3 = params["w3"], params["b3"]
    w4, b4 = params["w4"], params["b4"]
    w_eff = w1 @ w2 @ w3 @ w4                        # [F, 1]
    b_eff = ((b1 @ w2 + b2) @ w3 + b3) @ w4 + b4     # [1, 1]
    return w_eff, b_eff


def house_price_forward(x, params, *, tile_n=512):
    """x: [N, F] float32. params: dict w1..w4 ([in,out]) and b1..b4 ([1,out]).
    Returns [N] float32 (== PyTorch forward's x.view(-1))."""
    N, F = x.shape

    w_eff, b_eff = fold_affine_params(params)        # [F, 1], [1, 1]
    wt = w_eff.T                                     # [1, F]

    # Lane-dense tiling over the batch axis.
    tile_n = max(128, _round_up(tile_n, 128))
    tile_n = min(tile_n, _round_up(N, 128))
    n_pad = _round_up(N, tile_n)
    if n_pad != N:
        x = jnp.pad(x, ((0, n_pad - N), (0, 0)))
    xt = x.T                                         # [F, n_pad], batch on lanes
    num_tiles = n_pad // tile_n

    out = pl.pallas_call(
        house_price_kernel,
        out_shape=jax.ShapeDtypeStruct((num_tiles, tile_n), jnp.float32),
        grid=(num_tiles,),
        in_specs=[
            pl.BlockSpec((F, tile_n), lambda i: (0, i)),   # x^T tile over batch
            pl.BlockSpec((1, F), lambda i: (0, 0)),        # folded weight
            pl.BlockSpec((1, 1), lambda i: (0, 0)),        # folded bias
        ],
        out_specs=pl.BlockSpec((1, tile_n), lambda i: (i, 0)),
        compiler_params=pltpu.CompilerParams(
            dimension_semantics=("parallel",),
            vmem_limit_bytes=32 * 1024 * 1024,
        ),
    )(xt, wt, b_eff)

    # x.view(-1) in the PyTorch module (drop batch padding).
    return out.reshape(-1)[:N]


def init_params(key, num_feature):
    """nn.Linear-shaped params; weights stored transposed as [in, out]."""
    dims = [(num_feature, 64), (64, 128), (128, 32), (32, 1)]
    params = {}
    for idx, (din, dout) in enumerate(dims, start=1):
        key, kw, kb = jax.random.split(key, 3)
        bound = 1.0 / jnp.sqrt(jnp.float32(din))  # PyTorch default U(-1/sqrt(in), 1/sqrt(in))
        params[f"w{idx}"] = jax.random.uniform(
            kw, (din, dout), jnp.float32, minval=-bound, maxval=bound)
        params[f"b{idx}"] = jax.random.uniform(
            kb, (1, dout), jnp.float32, minval=-bound, maxval=bound)
    return params


if __name__ == "__main__":
    num_feature = 32
    batch = 8

    key = jax.random.PRNGKey(0)
    key, kx = jax.random.split(key)
    x = jax.random.normal(kx, (batch, num_feature), jnp.float32)
    params = init_params(key, num_feature)

    y = house_price_forward(x, params)
    y = jax.block_until_ready(y)

    # Pure-JAX reference of the original (unfolded) 4-layer chain.
    h = x
    for i in range(1, 5):
        h = h @ params[f"w{i}"] + params[f"b{i}"]
    ref = h.reshape(-1)

    assert y.shape == (batch,)
    assert jnp.allclose(y, ref, atol=1e-4, rtol=1e-4)

    print("KERNEL_OK")
</pallas_src>

<mosaic_0001>
module attributes {stable_mosaic.version = 11 : i64} {
  func.func @house_price_kernel(%arg0: i32, %arg1: memref<32x128xf32, #tpu.memory_space<vmem>>, %arg2: memref<1x32xf32, #tpu.memory_space<vmem>>, %arg3: memref<1x1xf32, #tpu.memory_space<vmem>>, %arg4: memref<1x128xf32, #tpu.memory_space<vmem>>) attributes {dimension_semantics = [#tpu.dimension_semantics<parallel>], iteration_bounds = array<i64: 1>, scalar_prefetch = 0 : i64, scratch_operands = 0 : i64, tpu.core_type = #tpu.core_type<tc>, window_params = [{transform_indices = @transform_0, window_bounds = array<i64: 32, 128>}, {pipeline_mode = #tpu.pipeline_mode<synchronous>, transform_indices = @transform_1, window_bounds = array<i64: 1, 32>}, {pipeline_mode = #tpu.pipeline_mode<synchronous>, transform_indices = @transform_2, window_bounds = array<i64: 1, 1>}, {transform_indices = @transform_3, window_bounds = array<i64: 1, 128>}]} {
    %c0 = arith.constant 0 : index
    %c0_0 = arith.constant 0 : index
    %0 = vector.load %arg2[%c0, %c0_0] : memref<1x32xf32, #tpu.memory_space<vmem>>, vector<1x32xf32>
    %c0_1 = arith.constant 0 : index
    %c0_2 = arith.constant 0 : index
    %1 = vector.load %arg1[%c0_1, %c0_2] : memref<32x128xf32, #tpu.memory_space<vmem>>, vector<32x128xf32>
    %cst = arith.constant dense<0.000000e+00> : vector<1x128xf32>
    %2 = tpu.matmul %0, %1, %cst {dimension_numbers = #tpu.dot_dimension_numbers<[1], [0], [0], [1], [0, 0, 1, 1], [], []>} : vector<1x32xf32>, vector<32x128xf32>, vector<1x128xf32> -> vector<1x128xf32>
    %c0_3 = arith.constant 0 : index
    %c0_4 = arith.constant 0 : index
    %3 = vector.load %arg3[%c0_3, %c0_4] : memref<1x1xf32, #tpu.memory_space<vmem>>, vector<1x1xf32>
    %4 = vector.broadcast %3 : vector<1x1xf32> to vector<1x128xf32>
    %5 = arith.addf %2, %4 : vector<1x128xf32>
    %c0_5 = arith.constant 0 : index
    %c0_6 = arith.constant 0 : index
    %6 = vector.load %arg4[%c0_5, %c0_6] : memref<1x128xf32, #tpu.memory_space<vmem>>, vector<1x128xf32>
    tpu.vector_store %arg4[%c0_5, %c0_6], %5 {strides = array<i32>} : memref<1x128xf32, #tpu.memory_space<vmem>>, vector<1x128xf32>,
    return
  }
  func.func @transform_0(%arg0: i32) -> (i32, i32) {
    %c0_i32 = arith.constant 0 : i32
    %c0_i32_0 = arith.constant 0 : i32
    return %c0_i32, %arg0 : i32, i32
  }
  func.func @transform_1(%arg0: i32) -> (i32, i32) {
    %c0_i32 = arith.constant 0 : i32
    %c0_i32_0 = arith.constant 0 : i32
    %c0_i32_1 = arith.constant 0 : i32
    return %c0_i32, %c0_i32_0 : i32, i32
  }
  func.func @transform_2(%arg0: i32) -> (i32, i32) {
    %c0_i32 = arith.constant 0 : i32
    %c0_i32_0 = arith.constant 0 : i32
    %c0_i32_1 = arith.constant 0 : i32
    return %c0_i32, %c0_i32_0 : i32, i32
  }
  func.func @transform_3(%arg0: i32) -> (i32, i32) {
    %c0_i32 = arith.constant 0 : i32
    %c0_i32_0 = arith.constant 0 : i32
    return %arg0, %c0_i32 : i32, i32
  }
}

</mosaic_0001>

<bundles_post_ra>
// kernel: tpu_custom_call.1
= control target key start
LH: loop header
LB: loop body
LE: loop exit
PB: predicated region body
PF: predicated region fallthrough
CT: control target
= control target key end

     0   :  { %s244_s0 = inlined_call_operand.hbm [shape: f32[32,128], index: 0, kind: input, shape index: {}]   ;;  %s245_s1 = inlined_call_operand.vmem [shape: f32[1,32], index: 1, kind: input, shape index: {}]   ;;  %s246_s2 = inlined_call_operand.<no memory space> [shape: f32[1,1], index: 2, kind: input, shape index: {}]   ;;  %s247_s3 = inlined_call_operand.hbm [shape: f32[1,128], index: 3, kind: output, shape index: {}]  }
   0x1   :  { %v8_v0 = vstv %s246_s2 }
   0x2   :  { %9 = vst [vmem:[#allocation2] sm:$0x1] %v8_v0 }
   0x3   :  { %10 = vsyncpa [#allocation4], 0 }
   0x4   :  { %11 = vsyncpa [#allocation5], 0  ;;  %s205_s14 = smov [#allocation3]  }
   0x5   :  { %s17_s15 = sshll.u32 %s205_s14, 4  ;;  %s18_s15 = int_to_ptr.vmem [resolvable:$true] %s17_s15 }
   0x6   :  { %s169_s16 = scalar_lea.vmem %s18_s15, 512  ;;  %p174_p1 = scmp.lt.s32.totalorder %s18_s15, %s18_s15 }
   0x7   :  { %p170_p0 = scmp.ne.s32.totalorder %s18_s15, %s169_s16  ;;  %p175_p2 = scmp.lt.s32.totalorder %s169_s16, %s169_s16 }
   0x9   :  { %p176_p3 = por %p175_p2, %p174_p1 }
   0xb   :  { %p177_p4 = pnand %p176_p3, %p170_p0 }
   0xd   :  { %180 = shalt.err (!%p177_p4)
}
   0xe   :  { %s206_s17 = smov 128   ;;  %s207_s18 = smov 8  }
   0xf   :  { %23 = dma.hbm_to_vmem [thread:$0]  %s244_s0, 512, %s18_s15, [#allocation4], %s206_s17, %s206_s17, %s207_s18  }
  0x10   :  { %201 = dma.done.wait [#allocation4], 512  }
  0x11   :  { %202 = vsyncadd [#allocation4], 4294966784  ;;  %v208_v1 = vmov 0.0   ;;  %vm209_vm0 = vmmov 0   ;;  %v210_v2 = vmov 0   ;;  %v35_v3 = vld [vmem:[#allocation3 + $0x18] sm:$0xff]  ;;  %v42_v9 = vlaneseq }
  0x12   :  { %142 = vmatprep.subr.mxu0 %v208_v1  ;;  %150 = vmatprep.mubr.msk.f32.mxu0 %vm209_vm0, %v208_v1  ;;  %v34_v4 = vld [vmem:[#allocation3 + $0x10] sm:$0xff]  ;;  %v36_v5 = vld [vmem:[#allocation2] sm:$0x1]  ;;  %v33_v6 = vld [vmem:[#allocation3 + $0x8] sm:$0xff]  ;;  %vm46_vm1 = vcmask 261120   ;;  %s211_s21 = smov [#allocation6]  }
  0x13   :  { %160 = vset.pattern.permute.xlu0 %v210_v2  ;;  %143 = vmatpush3.msra.mxu0 %v35_v3  ;;  %v32_v7 = vld [vmem:[#allocation3] sm:$0xff]  ;;  %v31_v8 = vld [vmem:[%s245_s1] sm:$0x1]  ;;  %v43_v10 = vshrl.u32 %v42_v9, 7  ;;  %s127_s22 = sshll.u32 %s211_s21, 4  ;;  %s128_s22 = int_to_ptr.vmem [resolvable:$true] %s127_s22 }
  0x14   :  { %144 = vmatprep.subr.mxu0 %v208_v1  ;;  %39 = vperm.xlu0 %160, %v36_v5   ;;  %s181_s23 = scalar_lea.vmem %s128_s22, 16  ;;  %s185_s24 = scalar_lea.vmem %s128_s22, 32 }
  0x15   :  { %145 = vmatpush3.msra.mxu0 %v34_v4  ;;  %v44_v11 = vsub.s32 0, %v43_v10  ;;  %p182_p5 = scmp.ne.s32.totalorder %s128_s22, %s181_s23  ;;  %p186_p6 = scmp.lt.s32.totalorder %s128_s22, %s128_s22 }
  0x16   :  { %146 = vmatprep.subr.mxu0 %v208_v1  ;;  %p187_p7 = scmp.lt.s32.totalorder %s185_s24, %s181_s23 }
  0x17   :  { %147 = vmatpush3.msra.mxu0 %v33_v6 }
  0x18   :  { %148 = vmatprep.subr.mxu0 %v208_v1  ;;  %p188_p8 = por %p187_p7, %p186_p6 }
  0x19   :  { %149 = vmatpush3.msra.mxu0 %v32_v7 }
  0x1a   :  { %151 = vmatmul.mubr.msk.f32.vlgmr.msra.gmra.mxu0 %vm46_vm1, %v31_v8  ;;  %p189_p9 = pnand %p188_p8, %p182_p5 }
  0x8f   :  { %v40_v12 = vpop.permute.xlu0 %39 }
  0x90   :  { %v45_v13 = vrot.slane %v40_v12, %v44_v11 }
  0xda   :  { %v116_v14 = vpop.f32.mrf.mxu0 }
  0xdb   :  { %v117_v15 = vadd.f32 %v116_v14, %v45_v13 }
  0xdc   :  { %v152_v16 = vpop.f32.mrf.mxu0 }
  0xdd   :  { %120 = vst [vmem:[#allocation6] sm:$0x1] %v117_v15 }
  0xde   :  { %192 = shalt.err (!%p189_p9)
}
  0xdf   :  { %130 = dma.vmem_to_hbm [thread:$0]  %s128_s22, 16, %s247_s3, [#allocation5]  }
  0xe0   :  { %203 = dma.done.wait [#allocation5], 16  }
  0xe1   :  { %204 = vsyncadd [#allocation5], 4294967280 }
  0xe2   :  { %134 = vsyncpa [#allocation4], 1 }
  0xe3   :  { %135 = vsyncpa [#allocation5], 1 }

</bundles_post_ra>
